<compile_context>
chip_gen: v7x
topology: tpu7x:2x2x1
jax: 0.10.0
libtpu: 0.0.40
codegen_flags: <defaults>
</compile_context>

<pallas_src>
import functools

import jax
import jax.numpy as jnp
from jax import lax
from jax.experimental import pallas as pl
from jax.experimental.pallas import tpu as pltpu


_MIB = 1 << 20
LANE = 1024                      # lane width used for free dense reshapes


def _round_up(x, m):
    return (x + m - 1) // m * m


def _device_params():
    """Per-generation budgets: NCORES, VMEM limits, target block size."""
    try:
        kind = jax.devices()[0].device_kind.lower()
    except Exception:  # pragma: no cover - defensive
        kind = ""
    is_v7 = "v7" in kind
    is_megacore = ("v4" in kind) or ("v5p" in kind) or (kind.strip() == "tpu v5")
    if is_v7:                                   # 64 MiB VMEM / TC, 2 TCs
        lead = getattr(pltpu, "CORE_PARALLEL", "parallel")
        return dict(ncores=2, lead_sem=lead,
                    resident_vmem_budget=44 * _MIB,
                    tiled_vmem_budget=44 * _MIB,
                    target_block_bytes=4 * _MIB)
    if is_megacore:                             # v4 / v5p: 2 TCs, 128 MiB VMEM
        return dict(ncores=2, lead_sem="parallel",
                    resident_vmem_budget=96 * _MIB,
                    tiled_vmem_budget=80 * _MIB,
                    target_block_bytes=2 * _MIB)
    # v5e / v6e: single TensorCore, 128 MiB physical VMEM
    return dict(ncores=1, lead_sem="arbitrary",
                resident_vmem_budget=100 * _MIB,
                tiled_vmem_budget=80 * _MIB,
                target_block_bytes=2 * _MIB)


def _dense_view_shape(B, T):
    """A *free* (bitcast) reshape of the flat signal to a sublane-dense 2-D
    slab, if one exists.  Returns (rows, cols) or None."""
    n = B * T
    if n % LANE == 0 and n >= 8 * LANE:
        return (n // LANE, LANE)
    if n % 128 == 0 and n >= 8 * 128:
        return (n // 128, 128)
    return None


# ----------------------------------------------------------------------------
# Resident kernel (common case): whole signal lives in VMEM.
# 1 HBM read + 1 HBM write; numerically stable two-pass variance.
# ----------------------------------------------------------------------------
def _resident_kernel(x_ref, o_ref, *, n):
    inv_n = 1.0 / n                                   # Python double constants
    inv_nm1 = 1.0 / (n - 1) if n > 1 else float("nan")   # ddof=1 (torch .std())
    x = x_ref[...].astype(jnp.float32)
    mean = jnp.sum(x) * inv_n
    x = x - mean
    var = jnp.sum(x * x) * inv_nm1
    inv_std = lax.rsqrt(var)
    o_ref[...] = (x * inv_std).astype(o_ref.dtype)
    # TODO(synk): on v7x a streamed variant (reduce-on-arrival then
    # normalize+write) would overlap the big DMAs with compute.


def _standardize_resident(s, out_dtype, dev):
    B, T = s.shape
    n = B * T
    dense = _dense_view_shape(B, T)
    x2d = s.reshape(dense) if dense is not None else s     # free reshape / no-op
    out2d = pl.pallas_call(
        functools.partial(_resident_kernel, n=n),
        out_shape=jax.ShapeDtypeStruct(x2d.shape, out_dtype),
        in_specs=[pl.BlockSpec(memory_space=pltpu.MemorySpace.VMEM)],
        out_specs=pl.BlockSpec(memory_space=pltpu.MemorySpace.VMEM),
        compiler_params=pltpu.CompilerParams(
            vmem_limit_bytes=dev["resident_vmem_budget"]),
    )(x2d)
    return out2d.reshape(B, T)


# ----------------------------------------------------------------------------
# Tiled path (very long clips).  Pass 1: streaming reduce over (B, TILE_T)
# column blocks of the ORIGINAL layout (no pad / no flatten); vreg-carried
# partial sums, tiny (B, CW) scratch, masked ragged tail.  Pass 2: normalize,
# computing mean / inv_std in-kernel from the per-core partials.
# ----------------------------------------------------------------------------
def _accumulate(x_ref, acc_s, acc_q, n_chunks, cw, valid_cols):
    """Add sum / sum-of-squares of the first n_chunks*cw columns of this block
    into the scratch accumulators.  valid_cols=None -> no masking."""
    rows = x_ref.shape[0]
    zero = jnp.zeros((rows, cw), jnp.float32)
    if valid_cols is not None:
        col = lax.broadcasted_iota(jnp.int32, (rows, cw), 1)

    def body(g, carry):
        s, q = carry
        start = pl.multiple_of(g * cw, cw)
        xg = x_ref[:, pl.ds(start, cw)].astype(jnp.float32)
        if valid_cols is not None:
            xg = jnp.where(col + g * cw < valid_cols, xg, 0.0)
        return s + xg, q + xg * xg

    s, q = lax.fori_loop(0, n_chunks, body, (zero, zero),
                         unroll=min(8, n_chunks))
    # Scratch is touched once per tile (2 ld + 2 st), not once per vreg.
    acc_s[...] += s
    acc_q[...] += q


def _reduce_kernel(x_ref, psum_ref, psq_ref, acc_s, acc_q, *,
                   ncores, npc, nt, tile_t, cw, t_total):
    c = pl.program_id(0)
    i = pl.program_id(1)
    t = c * npc + i if ncores > 1 else i          # logical tile index

    @pl.when(i == 0)
    def _():
        acc_s[...] = jnp.zeros_like(acc_s)
        acc_q[...] = jnp.zeros_like(acc_q)

    full_chunks = tile_t // cw
    tail_cols = t_total - (nt - 1) * tile_t        # 1 .. tile_t (static)

    if tail_cols == tile_t and ncores * npc == nt:
        # Every grid step maps to a full tile: no masking, no dead steps.
        _accumulate(x_ref, acc_s, acc_q, full_chunks, cw, None)
    else:
        @pl.when(t < nt - 1)
        def _():
            _accumulate(x_ref, acc_s, acc_q, full_chunks, cw, None)

        @pl.when(t == nt - 1)
        def _():
            if tail_cols == tile_t:
                _accumulate(x_ref, acc_s, acc_q, full_chunks, cw, None)
            else:
                _accumulate(x_ref, acc_s, acc_q, pl.cdiv(tail_cols, cw), cw,
                            tail_cols)
        # Steps with t >= nt (only if ncores does not divide nt) add nothing.

    @pl.when(i == npc - 1)
    def _():
        psum_ref[...] = jnp.full(psum_ref.shape, jnp.sum(acc_s[...]),
                                 jnp.float32)
        psq_ref[...] = jnp.full(psq_ref.shape, jnp.sum(acc_q[...]),
                                jnp.float32)


def _normalize_kernel(psum_ref, psq_ref, x_ref, o_ref, *,
                      inv_n, inv_nm1, n_over_nm1, inv_slots):
    # Combine per-core partials and compute the stats in-kernel (EUP rsqrt);
    # no XLA glue between the two pallas_calls.
    total = jnp.sum(psum_ref[...]) * inv_slots
    total_sq = jnp.sum(psq_ref[...]) * inv_slots
    mean = total * inv_n
    var = total_sq * inv_nm1 - n_over_nm1 * mean * mean
    inv_std = lax.rsqrt(var)
    o_ref[...] = ((x_ref[...].astype(jnp.float32) - mean) * inv_std).astype(
        o_ref.dtype)


def _standardize_tiled(s, out_dtype, dev, tile_t=None):
    B, T = s.shape
    n = B * T
    rows_worst = _round_up(B, 8)                 # worst-case sublane padding
    cw = max(128, (8 * 1024) // rows_worst // 128 * 128)   # chunk width
    budget = dev["tiled_vmem_budget"]

    # Block size: target ~2-4 MiB of real data, but keep the worst-case padded
    # footprint of pass 2 (2 in + 2 out buffers) inside the VMEM budget.
    cap_cols = max(cw, (budget - 4 * _MIB) // (4 * 4 * rows_worst))
    tgt_cols = max(cw, dev["target_block_bytes"] // (4 * B))
    if tile_t is None:
        tile_t = min(tgt_cols, cap_cols)
    tile_t = min(tile_t, cap_cols, _round_up(T, cw))
    tile_t = max(cw, tile_t // cw * cw)

    nt = pl.cdiv(T, tile_t)
    ncores = min(dev["ncores"], nt)
    npc = pl.cdiv(nt, ncores)

    if ncores == 1:
        x_map = lambda c, i: (0, i)
        sem1 = ("arbitrary", "arbitrary")
    else:
        x_map = lambda c, i: (0, jnp.minimum(c * npc + i, nt - 1))
        lead = dev["lead_sem"]
        arb = "arbitrary" if isinstance(lead, str) else getattr(
            pltpu, "ARBITRARY", "arbitrary")
        sem1 = (lead, arb)

    psum, psq = pl.pallas_call(
        functools.partial(_reduce_kernel, ncores=ncores, npc=npc, nt=nt,
                          tile_t=tile_t, cw=cw, t_total=T),
        out_shape=(jax.ShapeDtypeStruct((ncores, 8, 128), jnp.float32),
                   jax.ShapeDtypeStruct((ncores, 8, 128), jnp.float32)),
        grid=(ncores, npc),
        in_specs=[pl.BlockSpec((B, tile_t), x_map)],
        out_specs=(pl.BlockSpec((1, 8, 128), lambda c, i: (c, 0, 0)),
                   pl.BlockSpec((1, 8, 128), lambda c, i: (c, 0, 0))),
        scratch_shapes=[pltpu.VMEM((B, cw), jnp.float32),   # running sum
                        pltpu.VMEM((B, cw), jnp.float32)],  # running sum(x^2)
        compiler_params=pltpu.CompilerParams(
            dimension_semantics=sem1, vmem_limit_bytes=budget),
    )(s)

    inv_n = 1.0 / n
    inv_nm1 = 1.0 / (n - 1) if n > 1 else float("nan")
    n_over_nm1 = n / (n - 1) if n > 1 else float("nan")

    out = pl.pallas_call(
        functools.partial(_normalize_kernel, inv_n=inv_n, inv_nm1=inv_nm1,
                          n_over_nm1=n_over_nm1, inv_slots=1.0 / (8 * 128)),
        out_shape=jax.ShapeDtypeStruct((B, T), out_dtype),
        grid=(nt,),
        in_specs=[pl.BlockSpec((ncores, 8, 128), lambda i: (0, 0, 0)),
                  pl.BlockSpec((ncores, 8, 128), lambda i: (0, 0, 0)),
                  pl.BlockSpec((B, tile_t), lambda i: (0, i))],
        out_specs=pl.BlockSpec((B, tile_t), lambda i: (0, i)),
        compiler_params=pltpu.CompilerParams(
            dimension_semantics=("parallel",), vmem_limit_bytes=budget),
    )(psum, psq, s)
    return out


def whisper_signal_normalize(s, *, force_tiled=False, tile_t=None):
    """JAX/Pallas equivalent of the tensor math in Whisper.forward:
        s = s.squeeze(); s = s.reshape(1,-1) if ndim==1
        s = (s - s.mean()) / s.std()          # global stats, ddof=1
    """
    dev = _device_params()
    s = jnp.squeeze(s)
    assert s.ndim <= 2
    if s.ndim == 1:
        s = s.reshape(1, -1)
    B, T = s.shape
    n = B * T

    # Conservative (worst-case sublane padding) VMEM footprint estimate of the
    # fused resident kernel: in + out + ~2 f32 temporaries.
    dense = _dense_view_shape(B, T)
    rows_eff, cols_eff = dense if dense is not None else (_round_up(B, 8), T)
    resident_footprint = 4 * rows_eff * cols_eff * 4

    if (not force_tiled) and resident_footprint <= dev["resident_vmem_budget"]:
        out = _standardize_resident(s, s.dtype, dev)
    else:
        out = _standardize_tiled(s, s.dtype, dev, tile_t=tile_t)

    # TODO(synk): downstream of the normalization, Whisper.forward runs
    # torchaudio resampling, WhisperProcessor feature extraction,
    # autoregressive generation/decoding, regex text normalization and WER —
    # pretrained-model / string ops with no Pallas equivalent.
    return out


if __name__ == "__main__":
    key = jax.random.PRNGKey(0)
    k1, k2, k3 = jax.random.split(key, 3)

    # Case 1: small clip with an extra leading singleton dim (exercises
    # squeeze()); takes the whole-signal-resident VMEM fast path.
    s1 = jax.random.normal(k1, (1, 2, 2048), dtype=jnp.float32) * 0.3 + 0.1
    out1 = jax.block_until_ready(whisper_signal_normalize(s1))
    r1 = jnp.squeeze(s1)
    ref1 = (r1 - r1.mean()) / jnp.std(r1, ddof=1)
    assert out1.shape == (2, 2048)
    assert jnp.allclose(out1, ref1, atol=1e-4, rtol=1e-4)

    # Case 2: ragged length forced through the tiled two-pass path
    # (full tiles + masked tail tile, no pad / no slice).
    s2 = jax.random.normal(k2, (2, 3000), dtype=jnp.float32) * 2.0 - 0.5
    out2 = jax.block_until_ready(
        whisper_signal_normalize(s2, force_tiled=True, tile_t=1024))
    ref2 = (s2 - s2.mean()) / jnp.std(s2, ddof=1)
    assert out2.shape == (2, 3000)
    assert jnp.allclose(out2, ref2, atol=1e-4, rtol=1e-4)

    # Case 3: 1-D mono signal, exact multiple of the tile width (no tail),
    # exercises the reshape(1, -1) branch and the unmasked tiled path.
    s3 = jax.random.normal(k3, (4096,), dtype=jnp.float32) * 1.5 + 0.25
    out3 = jax.block_until_ready(
        whisper_signal_normalize(s3, force_tiled=True, tile_t=1024))
    ref3 = (s3 - s3.mean()) / jnp.std(s3, ddof=1)
    assert out3.shape == (1, 4096)
    assert jnp.allclose(out3.reshape(-1), ref3, atol=1e-4, rtol=1e-4)

    print("KERNEL_OK")
</pallas_src>

<mosaic_0001>
module attributes {stable_mosaic.version = 11 : i64} {
  func.func @_resident_kernel(%arg0: memref<32x128xf32, #tpu.memory_space<vmem>>, %arg1: memref<32x128xf32, #tpu.memory_space<vmem>>) attributes {dimension_semantics = [], scalar_prefetch = 0 : i64, scratch_operands = 0 : i64, tpu.core_type = #tpu.core_type<tc>} {
    %c0 = arith.constant 0 : index
    %c0_0 = arith.constant 0 : index
    %0 = vector.load %arg0[%c0, %c0_0] : memref<32x128xf32, #tpu.memory_space<vmem>>, vector<32x128xf32>
    %1 = vector.shape_cast %0 : vector<32x128xf32> to vector<1x32x128xf32>
    %cst = arith.constant dense<0.000000e+00> : vector<1xf32>
    %2 = vector.multi_reduction <add>, %1, %cst [1, 2] : vector<1x32x128xf32> to vector<1xf32>
    %3 = vector.shape_cast %2 : vector<1xf32> to vector<1x1x1xf32>
    %4 = vector.extract %3[0, 0, 0] : f32 from vector<1x1x1xf32>
    %cst_1 = arith.constant 2.44140625E-4 : f32
    %5 = arith.mulf %4, %cst_1 : f32
    %6 = vector.broadcast %5 : f32 to vector<32x128xf32>
    %7 = arith.subf %0, %6 : vector<32x128xf32>
    %8 = arith.mulf %7, %7 : vector<32x128xf32>
    %9 = vector.shape_cast %8 : vector<32x128xf32> to vector<1x32x128xf32>
    %cst_2 = arith.constant dense<0.000000e+00> : vector<1xf32>
    %10 = vector.multi_reduction <add>, %9, %cst_2 [1, 2] : vector<1x32x128xf32> to vector<1xf32>
    %11 = vector.shape_cast %10 : vector<1xf32> to vector<1x1x1xf32>
    %12 = vector.extract %11[0, 0, 0] : f32 from vector<1x1x1xf32>
    %cst_3 = arith.constant 2.44200259E-4 : f32
    %13 = arith.mulf %12, %cst_3 : f32
    %14 = math.rsqrt %13 : f32
    %15 = vector.broadcast %14 : f32 to vector<32x128xf32>
    %16 = arith.mulf %7, %15 : vector<32x128xf32>
    %c0_4 = arith.constant 0 : index
    %c0_5 = arith.constant 0 : index
    %17 = vector.load %arg1[%c0_4, %c0_5] : memref<32x128xf32, #tpu.memory_space<vmem>>, vector<32x128xf32>
    tpu.vector_store %arg1[%c0_4, %c0_5], %16 {strides = array<i32>} : memref<32x128xf32, #tpu.memory_space<vmem>>, vector<32x128xf32>,
    return
  }
}

</mosaic_0001>

<bundles_post_ra>
// kernel: tpu_custom_call.1
= control target key start
LH: loop header
LB: loop body
LE: loop exit
PB: predicated region body
PF: predicated region fallthrough
CT: control target
= control target key end

     0   :  { %6 = vsyncpa [#allocation3], 0  ;;  %s195_s0 = inlined_call_operand.hbm [shape: f32[32,128], index: 0, kind: input, shape index: {}]   ;;  %s196_s1 = inlined_call_operand.hbm [shape: f32[32,128], index: 1, kind: output, shape index: {}]  }
   0x1   :  { %7 = vsyncpa [#allocation4], 0  ;;  %s151_s6 = smov [#allocation2]   ;;  %s103_s10 = scalar_lea.hbm %s195_s0, 512 }
   0x2   :  { %s13_s7 = sshll.u32 %s151_s6, 4  ;;  %p104_p0 = scmp.ne.s32.totalorder %s195_s0, %s103_s10  ;;  %s14_s7 = int_to_ptr.vmem [resolvable:$true] %s13_s7 }
   0x3   :  { %p107_p1 = scmp.lt.u32.totalorder %s103_s10, %s195_s0 }
   0x5   :  { %p109_p2 = pnand %p107_p1, %p104_p0 }
   0x7   :  { %112 = shalt.err (!%p109_p2)
}
   0x8   :  { %s113_s15 = scalar_lea.vmem %s14_s7, 512  ;;  %p118_p4 = scmp.lt.s32.totalorder %s14_s7, %s14_s7 }
   0x9   :  { %p114_p3 = scmp.ne.s32.totalorder %s14_s7, %s113_s15  ;;  %p119_p5 = scmp.lt.s32.totalorder %s113_s15, %s113_s15 }
   0xb   :  { %p120_p6 = por %p119_p5, %p118_p4 }
   0xd   :  { %p121_p7 = pnand %p120_p6, %p114_p3 }
   0xf   :  { %124 = shalt.err (!%p121_p7)
}
  0x10   :  { %s152_s16 = smov 128   ;;  %s153_s17 = smov 8  }
  0x11   :  { %19 = dma.hbm_to_vmem [thread:$0]  %s195_s0, 512, %s14_s7, [#allocation3], %s152_s16, %s152_s16, %s153_s17  }
  0x12   :  { %147 = dma.done.wait [#allocation3], 512  }
  0x13   :  { %148 = vsyncadd [#allocation3], 4294966784  ;;  %v23_v0 = vld [vmem:[#allocation2] sm:$0xff]  ;;  %v24_v1 = vld [vmem:[#allocation2 + $0x8] sm:$0xff]  ;;  %s154_s23 = smov [#allocation5]  }
  0x14   :  { %v25_v2 = vld [vmem:[#allocation2 + $0x10] sm:$0xff]  ;;  %v27_v3 = vadd.f32 %v24_v1, %v23_v0  ;;  %v26_v4 = vld [vmem:[#allocation2 + $0x18] sm:$0xff]  ;;  %s79_s24 = sshll.u32 %s154_s23, 4  ;;  %s80_s24 = int_to_ptr.vmem [resolvable:$true] %s79_s24 }
  0x15   :  { %s125_s26 = scalar_lea.vmem %s80_s24, 512  ;;  %p130_p9 = scmp.lt.s32.totalorder %s80_s24, %s80_s24 }
  0x16   :  { %v28_v5 = vadd.f32 %v27_v3, %v25_v2  ;;  %p126_p8 = scmp.ne.s32.totalorder %s80_s24, %s125_s26  ;;  %p131_p10 = scmp.lt.s32.totalorder %s125_s26, %s125_s26 }
  0x18   :  { %v29_v6 = vadd.f32 %v28_v5, %v26_v4  ;;  %p132_p11 = por %p131_p10, %p130_p9 }
  0x1a   :  { %30 = vadd.xlane.f32.xlu0 %v29_v6  ;;  %p133_p12 = pnand %p132_p11, %p126_p8 }
  0xa7   :  { %v31_v7 = vpop.xlane.xlu0 %30 }
  0xa8   :  { %v32_v8 = vrot.slane %v31_v7, 4 }
  0xaa   :  { %v33_v9 = vadd.f32 %v32_v8, %v31_v7 }
  0xac   :  { %v34_v10 = vrot.slane %v33_v9, 2 }
  0xae   :  { %v35_v11 = vadd.f32 %v34_v10, %v33_v9 }
  0xb0   :  { %v36_v12 = vrot.slane %v35_v11, 1 }
  0xb2   :  { %v37_v13 = vadd.f32 %v36_v12, %v35_v11 }
  0xb4   :  { %91 = vpush %v37_v13 }
  0xe5   :  { %s92_s20 = spop %91 }
  0xe6   :  { %s39_s0 = smul.f32 0.00024414063, %s92_s20 }
  0xe8   :  { %v40_v14 = vstv %s39_s0 }
  0xe9   :  { %v41_v15 = vsub.f32 %v23_v0, %v40_v14  ;;  %v42_v16 = vsub.f32 %v24_v1, %v40_v14  ;;  %v43_v17 = vsub.f32 %v25_v2, %v40_v14  ;;  %v44_v18 = vsub.f32 %v26_v4, %v40_v14 }
  0xeb   :  { %v45_v19 = vmul.f32 %v41_v15, %v41_v15  ;;  %v46_v20 = vmul.f32 %v42_v16, %v42_v16  ;;  %v47_v21 = vmul.f32 %v43_v17, %v43_v17  ;;  %v48_v23 = vmul.f32 %v44_v18, %v44_v18 }
  0xed   :  { %v49_v22 = vadd.f32 %v46_v20, %v45_v19 }
  0xef   :  { %v50_v24 = vadd.f32 %v49_v22, %v47_v21 }
  0xf1   :  { %v51_v25 = vadd.f32 %v50_v24, %v48_v23 }
  0xf3   :  { %52 = vadd.xlane.f32.xlu0 %v51_v25 }
 0x180   :  { %v53_v26 = vpop.xlane.xlu0 %52 }
 0x181   :  { %v54_v27 = vrot.slane %v53_v26, 4 }
 0x183   :  { %v55_v28 = vadd.f32 %v54_v27, %v53_v26 }
 0x185   :  { %v56_v29 = vrot.slane %v55_v28, 2 }
 0x187   :  { %v57_v30 = vadd.f32 %v56_v29, %v55_v28 }
 0x189   :  { %v58_v31 = vrot.slane %v57_v30, 1 }
 0x18b   :  { %v59_v32 = vadd.f32 %v58_v31, %v57_v30 }
 0x18d   :  { %93 = vpush %v59_v32 }
 0x1be   :  { %s94_s21 = spop %93 }
 0x1bf   :  { %s61_s22 = smul.f32 0.00024420026, %s94_s21 }
 0x1c1   :  { %v62_v33 = vstv %s61_s22 }
 0x1c2   :  { %101 = vrsqrt.f32 %v62_v33 }
 0x1cc   :  { %v102_v34 = vpop.eup %101 }
 0x1cd   :  { %95 = vpush %v102_v34 }
 0x1fe   :  { %s96_s25 = spop %95 }
 0x1ff   :  { %v65_v35 = vstv %s96_s25 }
 0x200   :  { %v66_v36 = vmul.f32 %v65_v35, %v41_v15  ;;  %v67_v37 = vmul.f32 %v65_v35, %v42_v16  ;;  %v68_v38 = vmul.f32 %v65_v35, %v43_v17  ;;  %v69_v39 = vmul.f32 %v65_v35, %v44_v18 }
 0x202   :  { %70 = vst [vmem:[#allocation5] sm:$0xff] %v66_v36  ;;  %71 = vst [vmem:[#allocation5 + $0x8] sm:$0xff] %v67_v37 }
 0x203   :  { %72 = vst [vmem:[#allocation5 + $0x10] sm:$0xff] %v68_v38  ;;  %73 = vst [vmem:[#allocation5 + $0x18] sm:$0xff] %v69_v39 }
 0x204   :  { %136 = shalt.err (!%p133_p12)
}
 0x205   :  { %s137_s29 = scalar_lea.hbm %s196_s1, 512 }
 0x206   :  { %p138_p13 = scmp.ne.s32.totalorder %s196_s1, %s137_s29  ;;  %p141_p0 = scmp.lt.u32.totalorder %s137_s29, %s196_s1 }
 0x208   :  { %p143_p1 = pnand %p141_p0, %p138_p13 }
 0x20a   :  { %146 = shalt.err (!%p143_p1)
}
 0x20b   :  { %85 = dma.vmem_to_hbm [thread:$0]  %s80_s24, 512, %s196_s1, [#allocation4], %s152_s16, %s152_s16, %s153_s17  }
 0x20c   :  { %149 = dma.done.wait [#allocation4], 512  }
 0x20d   :  { %150 = vsyncadd [#allocation4], 4294966784 }
 0x20e   :  { %89 = vsyncpa [#allocation3], 1 }
 0x20f   :  { %90 = vsyncpa [#allocation4], 1 }

</bundles_post_ra>
